<compile_context>
chip_gen: v5e
topology: v5e:2x2
jax: 0.10.0
libtpu: 0.0.40
codegen_flags: <defaults>
</compile_context>

<pallas_src>
import functools

import jax
import jax.numpy as jnp
from jax.experimental import pallas as pl
from jax.experimental.pallas import tpu as pltpu


def _conv_mm_kernel(p_ref, w_ref, shift_ref, o_ref, *, slope):
    # (tm, K) @ (K, Cout_pad) on the MXU (bf16 in, f32 accumulate), then a
    # minimal f32 epilogue: fused (conv-bias + BN) shift and LeakyReLU.
    y = jnp.dot(p_ref[...], w_ref[...], preferred_element_type=jnp.float32)
    y = y + shift_ref[...]
    if slope != 1.0:                       # static: dropped for purely linear layers
        y = jnp.where(y > 0, y, slope * y)
    o_ref[...] = y.astype(o_ref.dtype)     # bf16 store: halve writeback bytes


@functools.lru_cache(maxsize=None)
def _vmem_limits():
    """Generation-dependent scoped-VMEM limit and tiling budget (bytes)."""
    try:
        cap = int(pltpu.get_tpu_info().vmem_capacity_bytes)   # 128 MiB v5e/v6e, 64 MiB v7x
    except Exception:
        cap = 64 * 1024 * 1024                                # conservative fallback
    limit = min((cap * 3) // 4, 100 * 1024 * 1024)
    budget = limit - 4 * 1024 * 1024                          # headroom for Mosaic scratch
    return int(limit), int(budget)


def _align_down(v, a, floor):
    return max(floor, (v // a) * a)


def _pick_tm(M, Kdim, cout_pad, budget):
    """Row-tile size: biggest tile that fits the budget, 256-aligned, even steps."""
    # Pallas double-buffers EVERY input block (even constant index maps), so
    # the "resident" weight/shift blocks cost 2x their size (v7x VMEM fix).
    resident = 2 * (Kdim * cout_pad * 2) + 2 * (8 * cout_pad * 4)
    per_row = 2 * (Kdim * 2) + 2 * (cout_pad * 2)   # 2x bf16 patch rows + 2x bf16 out rows
    tm_cap = max(16, (budget - resident) // max(per_row, 1))
    tm = min(M, 2048, tm_cap)
    if tm >= M:
        # Whole problem in one step: split into two even steps when cleanly
        # possible so v7x's second TensorCore gets work ('parallel' axis).
        if M >= 512 and (M // 2) % 256 == 0:
            return M // 2
        return M
    # Full-width MXU passes: 256-row alignment; fall back to bf16 sublane
    # packing granularity (16) for small tiles.
    tm = _align_down(tm, 256, 16) if tm >= 256 else _align_down(tm, 16, 16)
    # Prefer an even grid-step count (balances the two v7x TensorCores).
    steps = pl.cdiv(M, tm)
    if steps > 1 and steps % 2 == 1:
        tm2 = pl.cdiv(M, steps + 1)
        tm2 = _align_down(tm2, 256, 16) if tm2 >= 256 else _align_down(tm2, 16, 16)
        if pl.cdiv(M, tm2) % 2 == 0:
            tm = tm2
    return tm


def conv2d_fused(x_nhwc, w_oihw, b, stride, padding, *, scale=None, shift=None, slope=1.0):
    """Conv2d (PyTorch semantics) + folded BatchNorm affine + LeakyReLU.

    Accepts an input whose channel dim may be zero-padded (lane padding flowing
    from the previous Pallas layer); the extra channels get zero weight rows.
    """
    N, H, W, Cin = x_nhwc.shape
    Cout, Cin_w, Kh, Kw = w_oihw.shape
    assert Cin >= Cin_w
    if Cin > Cin_w:
        # Padded (zero) channels from the previous layer: zero weight rows.
        w_oihw = jnp.pad(w_oihw, ((0, 0), (0, Cin - Cin_w), (0, 0), (0, 0)))
    Ho = (H + 2 * padding - Kh) // stride + 1
    Wo = (W + 2 * padding - Kw) // stride + 1
    M = N * Ho * Wo
    Kdim = Kh * Kw * Cin

    # Fold conv bias and BN scale/shift into the matmul operands (host side).
    if scale is None:
        scale = jnp.ones((Cout,), jnp.float32)
    if shift is None:
        shift = jnp.zeros((Cout,), jnp.float32)
    wmat = jnp.transpose(w_oihw, (2, 3, 1, 0)).reshape(Kdim, Cout).astype(jnp.float32)
    wmat = wmat * scale[None, :]                       # fold BN scale into weights
    shift_fused = b.astype(jnp.float32) * scale + shift

    # Tiny layers: pallas_call launch + BlockSpec DMA setup dwarfs the math;
    # XLA fuses these small dots into surrounding ops for free.
    use_pallas = M >= 256

    # im2col (glue; static strided slices).  bf16 on the Pallas path halves the
    # inflated patch-matrix HBM bytes and doubles MXU throughput.
    src = x_nhwc.astype(jnp.bfloat16 if use_pallas else jnp.float32)
    xp = jnp.pad(src, ((0, 0), (padding, padding), (padding, padding), (0, 0)))
    rows = []
    for kh in range(Kh):
        for kw in range(Kw):
            rows.append(xp[:, kh:kh + Ho * stride:stride, kw:kw + Wo * stride:stride, :])
    patches = jnp.stack(rows, axis=3).reshape(M, Kdim)   # rows ordered (kh, kw, cin)

    if not use_pallas:
        y = patches @ wmat + shift_fused[None, :]
        if slope != 1.0:
            y = jnp.where(y > 0, y, slope * y)
        return y.reshape(N, Ho, Wo, Cout)

    # Lane-dense output: zero-pad Cout up to a multiple of 128 so every output
    # store is an unmasked full-lane vst; the padding flows to the next layer.
    cout_pad = ((Cout + 127) // 128) * 128
    w_pad = jnp.zeros((Kdim, cout_pad), jnp.bfloat16).at[:, :Cout].set(wmat.astype(jnp.bfloat16))
    shift_pad = jnp.zeros((1, cout_pad), jnp.float32).at[0, :Cout].set(shift_fused)

    vmem_limit, budget = _vmem_limits()
    tm = _pick_tm(M, Kdim, cout_pad, budget)
    grid = (pl.cdiv(M, tm),)
    out = pl.pallas_call(
        functools.partial(_conv_mm_kernel, slope=float(slope)),
        out_shape=jax.ShapeDtypeStruct((M, cout_pad), jnp.bfloat16),   # bf16 writeback
        grid=grid,
        in_specs=[
            pl.BlockSpec((tm, Kdim), lambda i: (i, 0)),         # patch rows (pipelined)
            pl.BlockSpec((Kdim, cout_pad), lambda i: (0, 0)),   # fused weights (resident)
            pl.BlockSpec((1, cout_pad), lambda i: (0, 0)),      # fused shift (resident)
        ],
        out_specs=pl.BlockSpec((tm, cout_pad), lambda i: (i, 0)),
        compiler_params=pltpu.CompilerParams(
            dimension_semantics=("parallel",),
            vmem_limit_bytes=vmem_limit,
            # Allow XLA to fuse the im2col producer into the kernel's patch
            # input instead of a separate HBM round trip.
            allow_input_fusion=[True, False, False],
        ),
    )(patches, w_pad, shift_pad)
    # No unpad slice here: padded channel lanes stay zero (zero shift, LeakyReLU(0)=0)
    # and get zero weight rows downstream; only the network output is sliced.
    return out.reshape(N, Ho, Wo, cout_pad)


def init_discriminator_params(key, in_channels, hidden_dims):
    """Deterministic parameter init matching the PyTorch module's shapes."""
    params = []
    chans = [in_channels] + list(hidden_dims)
    # stride-2 conv blocks
    for li in range(len(hidden_dims)):
        key, kw_, kb_, kg_, kbt_, km_, kv_ = jax.random.split(key, 7)
        cin, cout = chans[li], chans[li + 1]
        w = 0.05 * jax.random.normal(kw_, (cout, cin, 4, 4), jnp.float32)
        b = 0.01 * jax.random.normal(kb_, (cout,), jnp.float32)
        layer = {"w": w, "b": b, "stride": 2, "padding": 1, "slope": 0.2}
        if li > 0:  # blocks after the first have BatchNorm2d
            layer["bn"] = {
                "gamma": 1.0 + 0.1 * jax.random.normal(kg_, (cout,), jnp.float32),
                "beta": 0.1 * jax.random.normal(kbt_, (cout,), jnp.float32),
                "mean": 0.05 * jax.random.normal(km_, (cout,), jnp.float32),
                "var": jnp.abs(1.0 + 0.1 * jax.random.normal(kv_, (cout,), jnp.float32)),
                "eps": 1e-5,
            }
        params.append(layer)
    # final conv: hidden_dims[-1] -> 1, k=4, s=1, p=0, no BN / no activation
    key, kw_, kb_ = jax.random.split(key, 3)
    params.append({
        "w": 0.05 * jax.random.normal(kw_, (1, hidden_dims[-1], 4, 4), jnp.float32),
        "b": 0.01 * jax.random.normal(kb_, (1,), jnp.float32),
        "stride": 1, "padding": 0, "slope": 1.0, "bn": None,
    })
    return params


def discriminator_forward(params, x_nchw):
    # NCHW (PyTorch) -> NHWC for the kernels, back to NCHW at the end.
    x = jnp.transpose(x_nchw, (0, 2, 3, 1)).astype(jnp.float32)
    for layer in params:
        bn = layer.get("bn", None)
        if bn is not None:
            # TODO(synk): BatchNorm2d implemented with eval-mode running statistics
            # (train-mode batch-stat reduction not reproduced).
            inv = bn["gamma"] / jnp.sqrt(bn["var"] + bn["eps"])
            scale, shift = inv, bn["beta"] - bn["mean"] * inv
        else:
            scale, shift = None, None
        x = conv2d_fused(x, layer["w"], layer["b"], layer["stride"], layer["padding"],
                         scale=scale, shift=shift, slope=layer["slope"])
    # Slice off any padded channel lanes only at the network output.
    x = x[..., :params[-1]["w"].shape[0]]
    return jnp.transpose(x, (0, 3, 1, 2)).astype(jnp.float32)


def _reference_forward(params, x_nchw):
    """Pure-JAX f32 reference (lax conv) for a correctness check."""
    x = x_nchw.astype(jnp.float32)
    for layer in params:
        x = jax.lax.conv_general_dilated(
            x, layer["w"], window_strides=(layer["stride"],) * 2,
            padding=[(layer["padding"],) * 2] * 2,
            dimension_numbers=("NCHW", "OIHW", "NCHW"))
        x = x + layer["b"][None, :, None, None]
        bn = layer.get("bn", None)
        if bn is not None:
            inv = bn["gamma"] / jnp.sqrt(bn["var"] + bn["eps"])
            x = (x - bn["mean"][None, :, None, None]) * inv[None, :, None, None] \
                + bn["beta"][None, :, None, None]
        if layer["slope"] != 1.0:
            x = jnp.where(x > 0, x, layer["slope"] * x)
    return x


if __name__ == "__main__":
    key = jax.random.PRNGKey(0)
    k_x, k_p = jax.random.split(key)

    # Small, consistent shapes: batch=2, in_channels=4, spatial=32,
    # hidden_dims=[8, 16, 32]  (32 -> 16 -> 8 -> 4 -> final 4x4 valid conv -> 1x1)
    in_channels = 4
    hidden_dims = [8, 16, 32]
    x = jax.random.normal(k_x, (2, in_channels, 32, 32), jnp.float32)

    params = init_discriminator_params(k_p, in_channels, hidden_dims)

    fwd = jax.jit(lambda inp: discriminator_forward(params, inp))
    out = jax.block_until_ready(fwd(x))
    assert out.shape == (2, 1, 1, 1), out.shape
    assert out.dtype == jnp.float32

    # Correctness check vs a pure-JAX f32 reference (bf16 MXU operands and bf16
    # activation stores => loose tolerance relative to the reference's scale;
    # intended precision for a GAN discriminator).
    ref = jax.block_until_ready(_reference_forward(params, x))
    scale = float(jnp.max(jnp.abs(ref))) + 1e-6
    err = float(jnp.max(jnp.abs(out - ref)))
    assert err <= 0.1 * scale, (err, scale)

    print("KERNEL_OK")
</pallas_src>

<mosaic_0001>
module attributes {stable_mosaic.version = 11 : i64} {
  func.func @_conv_mm_kernel(%arg0: i32, %arg1: memref<256x64xbf16, #tpu.memory_space<vmem>>, %arg2: memref<64x128xbf16, #tpu.memory_space<vmem>>, %arg3: memref<1x128xf32, #tpu.memory_space<vmem>>, %arg4: memref<256x128xbf16, #tpu.memory_space<vmem>>) attributes {dimension_semantics = [#tpu.dimension_semantics<parallel>], iteration_bounds = array<i64: 2>, scalar_prefetch = 0 : i64, scratch_operands = 0 : i64, tpu.core_type = #tpu.core_type<tc>, window_params = [{transform_indices = @transform_0, window_bounds = array<i64: 256, 64>}, {pipeline_mode = #tpu.pipeline_mode<synchronous>, transform_indices = @transform_1, window_bounds = array<i64: 64, 128>}, {pipeline_mode = #tpu.pipeline_mode<synchronous>, transform_indices = @transform_2, window_bounds = array<i64: 1, 128>}, {transform_indices = @transform_3, window_bounds = array<i64: 256, 128>}]} {
    %c0 = arith.constant 0 : index
    %c0_0 = arith.constant 0 : index
    %0 = vector.load %arg1[%c0, %c0_0] : memref<256x64xbf16, #tpu.memory_space<vmem>>, vector<256x64xbf16>
    %c0_1 = arith.constant 0 : index
    %c0_2 = arith.constant 0 : index
    %1 = vector.load %arg2[%c0_1, %c0_2] : memref<64x128xbf16, #tpu.memory_space<vmem>>, vector<64x128xbf16>
    %cst = arith.constant dense<0.000000e+00> : vector<256x128xf32>
    %2 = tpu.matmul %0, %1, %cst {dimension_numbers = #tpu.dot_dimension_numbers<[1], [0], [0], [1], [0, 0, 1, 1], [], []>} : vector<256x64xbf16>, vector<64x128xbf16>, vector<256x128xf32> -> vector<256x128xf32>
    %c0_3 = arith.constant 0 : index
    %c0_4 = arith.constant 0 : index
    %3 = vector.load %arg3[%c0_3, %c0_4] : memref<1x128xf32, #tpu.memory_space<vmem>>, vector<1x128xf32>
    %4 = vector.broadcast %3 : vector<1x128xf32> to vector<256x128xf32>
    %5 = arith.addf %2, %4 : vector<256x128xf32>
    %cst_5 = arith.constant 0.000000e+00 : f32
    %6 = vector.broadcast %cst_5 : f32 to vector<256x128xf32>
    %7 = arith.cmpf ogt, %5, %6 : vector<256x128xf32>
    %cst_6 = arith.constant 2.000000e-01 : f32
    %8 = vector.broadcast %cst_6 : f32 to vector<256x128xf32>
    %9 = arith.mulf %8, %5 : vector<256x128xf32>
    %10 = arith.select %7, %5, %9 : vector<256x128xi1>, vector<256x128xf32>
    %11 = arith.truncf %10 : vector<256x128xf32> to vector<256x128xbf16>
    %c0_7 = arith.constant 0 : index
    %c0_8 = arith.constant 0 : index
    %12 = vector.load %arg4[%c0_7, %c0_8] : memref<256x128xbf16, #tpu.memory_space<vmem>>, vector<256x128xbf16>
    tpu.vector_store %arg4[%c0_7, %c0_8], %11 {strides = array<i32>} : memref<256x128xbf16, #tpu.memory_space<vmem>>, vector<256x128xbf16>,
    return
  }
  func.func @transform_0(%arg0: i32) -> (i32, i32) {
    %c0_i32 = arith.constant 0 : i32
    %c0_i32_0 = arith.constant 0 : i32
    return %arg0, %c0_i32 : i32, i32
  }
  func.func @transform_1(%arg0: i32) -> (i32, i32) {
    %c0_i32 = arith.constant 0 : i32
    %c0_i32_0 = arith.constant 0 : i32
    %c0_i32_1 = arith.constant 0 : i32
    return %c0_i32, %c0_i32_0 : i32, i32
  }
  func.func @transform_2(%arg0: i32) -> (i32, i32) {
    %c0_i32 = arith.constant 0 : i32
    %c0_i32_0 = arith.constant 0 : i32
    %c0_i32_1 = arith.constant 0 : i32
    return %c0_i32, %c0_i32_0 : i32, i32
  }
  func.func @transform_3(%arg0: i32) -> (i32, i32) {
    %c0_i32 = arith.constant 0 : i32
    %c0_i32_0 = arith.constant 0 : i32
    return %arg0, %c0_i32 : i32, i32
  }
}

</mosaic_0001>

<bundles_post_ra>
// kernel: _lambda_.1
= control target key start
LH: loop header
LB: loop body
LE: loop exit
PB: predicated region body
PF: predicated region fallthrough
CT: control target
= control target key end

     0   :  { %s948_s12 = smov 0   ;;  %s1073_s0 = inlined_call_operand.vmem [shape: bf16[512,64], index: 0, kind: input, shape index: {}]   ;;  %s1074_s1 = inlined_call_operand.vmem [shape: bf16[64,128], index: 1, kind: input, shape index: {}]   ;;  %s1075_s2 = inlined_call_operand.vmem [shape: f32[1,128], index: 2, kind: input, shape index: {}]   ;;  %s1076_s3 = inlined_call_operand.vmem [shape: bf16[512,128], index: 3, kind: output, shape index: {}]  }
   0x1 LB: > { %s677_s13 = sadd.s32 4294967295, %s926_s12   ;;  %p681_p0 = scmp.ge.s32.totalorder %s926_s12, 1  ;;  %s926_s12 = sphi %s948_s12, %s13_s12  }
   0x2   : > { %p138_p1 = scmp.lt.s32.totalorder %s926_s12, 3 }
   0x4   : > { %p139_p2 = pnand %p681_p0, %p138_p1 }
   0x5   : > { %s682_s16 = sshll.u32 (!%p139_p2), %s677_s13, 5 }
   0x6   : > { %142 = sbr.rel (%p139_p2) target bundleno = 225 (0xe1), region = 32  ;;  %p163_p3 = scmp.lt.s32.totalorder (!%p139_p2), %s682_s16, 63 }
   0xb   : > { %v803_v0 = vld [vmem:[%s1074_s1 + $0x18] sm:$0xff]  ;;  %v802_v1 = vld [vmem:[%s1074_s1 + $0x10] sm:$0xff]  ;;  %s1078_s16 = smov (!%p163_p3, %s682_s16), 63  ;;  %v801_v2 = vld [vmem:[%s1074_s1 + $0x8] sm:$0xff]  ;;  %vm323_vm0 = vcmask 523264  }
   0xc   : > { %376 = vmatpush.bf16.msra.mxu0 %v803_v0  ;;  %899 = vmatpush.bf16.msra.mxu1 %v803_v0  ;;  %s683_s21 = sshll.u32 %s1078_s16, 2  ;;  %v800_v3 = vld [vmem:[%s1074_s1] sm:$0xff] }
   0xd   : > { %900 = vmatpush.bf16.msra.mxu2 %v803_v0  ;;  %901 = vmatpush.bf16.msra.mxu3 %v803_v0  ;;  %s976_s26 = scalar_lea.vmem %s1073_s0, %s683_s21  ;;  %v1013_v22 = vld [vmem:[%s1075_s2] ss:$0 sm:$0xff]  ;;  %s1026_s4 = scalar_lea.vmem %s1076_s3, %s683_s21 }
   0xe   : > { %v784_v4 = vld [vmem:[%s976_s26] sm:$0xff]  ;;  %v785_v8 = vld [vmem:[%s976_s26 + $0x8] sm:$0xff]  ;;  %v786_v12 = vld [vmem:[%s976_s26 + $0x10] sm:$0xff] }
   0xf   : > { %v788_v5 = vld [vmem:[%s976_s26 + $0x20] sm:$0xff]  ;;  %v789_v9 = vld [vmem:[%s976_s26 + $0x28] sm:$0xff]  ;;  %v790_v13 = vld [vmem:[%s976_s26 + $0x30] sm:$0xff] }
  0x10   : > { %377 = vmatpush.bf16.msra.mxu0 %v802_v1  ;;  %902 = vmatpush.bf16.msra.mxu1 %v802_v1  ;;  %v792_v6 = vld [vmem:[%s976_s26 + $0x40] sm:$0xff]  ;;  %v793_v10 = vld [vmem:[%s976_s26 + $0x48] sm:$0xff]  ;;  %v794_v14 = vld [vmem:[%s976_s26 + $0x50] sm:$0xff] }
  0x11   : > { %903 = vmatpush.bf16.msra.mxu2 %v802_v1  ;;  %904 = vmatpush.bf16.msra.mxu3 %v802_v1  ;;  %v796_v7 = vld [vmem:[%s976_s26 + $0x60] sm:$0xff]  ;;  %v797_v11 = vld [vmem:[%s976_s26 + $0x68] sm:$0xff]  ;;  %v798_v15 = vld [vmem:[%s976_s26 + $0x70] sm:$0xff] }
  0x12   : > { %v787_v16 = vld [vmem:[%s976_s26 + $0x18] sm:$0xff] }
  0x13   : > { %v791_v17 = vld [vmem:[%s976_s26 + $0x38] sm:$0xff] }
  0x14   : > { %378 = vmatpush.bf16.msra.mxu0 %v801_v2  ;;  %905 = vmatpush.bf16.msra.mxu1 %v801_v2  ;;  %v795_v18 = vld [vmem:[%s976_s26 + $0x58] sm:$0xff] }
  0x15   : > { %906 = vmatpush.bf16.msra.mxu2 %v801_v2  ;;  %907 = vmatpush.bf16.msra.mxu3 %v801_v2  ;;  %v799_v19 = vld [vmem:[%s976_s26 + $0x78] sm:$0xff] }
  0x18   : > { %379 = vmatpush.bf16.msra.mxu0 %v800_v3  ;;  %908 = vmatpush.bf16.msra.mxu1 %v800_v3 }
  0x19   : > { %909 = vmatpush.bf16.msra.mxu2 %v800_v3  ;;  %910 = vmatpush.bf16.msra.mxu3 %v800_v3 }
  0x1b   : > { %766 = vmatmul.msk.bf16.vlgmr.msra.gmra.mxu0 %vm323_vm0, %v784_v4  ;;  %770 = vmatmul.msk.bf16.vlgmr.msra.gmra.mxu1 %vm323_vm0, %v788_v5 }
  0x1c   : > { %774 = vmatmul.msk.bf16.vlgmr.msra.gmra.mxu2 %vm323_vm0, %v792_v6  ;;  %778 = vmatmul.msk.bf16.vlgmr.msra.gmra.mxu3 %vm323_vm0, %v796_v7 }
  0x2b   : > { %767 = vmatmul.msk.bf16.gmra.mxu0 %vm323_vm0, %v785_v8  ;;  %771 = vmatmul.msk.bf16.gmra.mxu1 %vm323_vm0, %v789_v9 }
  0x2c   : > { %775 = vmatmul.msk.bf16.gmra.mxu2 %vm323_vm0, %v793_v10  ;;  %779 = vmatmul.msk.bf16.gmra.mxu3 %vm323_vm0, %v797_v11 }
  0x3b   : > { %768 = vmatmul.msk.bf16.gmra.mxu0 %vm323_vm0, %v786_v12  ;;  %772 = vmatmul.msk.bf16.gmra.mxu1 %vm323_vm0, %v790_v13 }
  0x3c   : > { %776 = vmatmul.msk.bf16.gmra.mxu2 %vm323_vm0, %v794_v14  ;;  %780 = vmatmul.msk.bf16.gmra.mxu3 %vm323_vm0, %v798_v15 }
  0x4b   : > { %769 = vmatmul.msk.bf16.gmra.mxu0 %vm323_vm0, %v787_v16  ;;  %773 = vmatmul.msk.bf16.gmra.mxu1 %vm323_vm0, %v791_v17 }
  0x4c   : > { %777 = vmatmul.msk.bf16.gmra.mxu2 %vm323_vm0, %v795_v18  ;;  %781 = vmatmul.msk.bf16.gmra.mxu3 %vm323_vm0, %v799_v19 }
  0x98   : > { %v381_v20 = vpop.f32.mrf.mxu0  ;;  %v401_v21 = vpop.f32.mrf.mxu1 }
  0x99   : > { %v382_v23 = vadd.f32 %v1013_v22, %v381_v20  ;;  %v402_v24 = vadd.f32 %v1013_v22, %v401_v21 }
  0x9b   : > { %v493_v29 = vmul.f32 0.2, %v382_v23  ;;  %v501_v30 = vmul.f32 0.2, %v402_v24  ;;  %vm461_vm1 = vcmp.gt.f32.partialorder %v382_v23, 0.0  ;;  %vm469_vm2 = vcmp.gt.f32.partialorder %v402_v24, 0.0 }
  0x9d   : > { %v525_v37 = vsel %vm461_vm1, %v382_v23, %v493_v29  ;;  %v533_v38 = vsel %vm469_vm2, %v402_v24, %v501_v30 }
  0x9f   : > { %v421_v25 = vpop.f32.mrf.mxu2  ;;  %v441_v26 = vpop.f32.mrf.mxu3 }
  0xa0   : > { %v383_v27 = vpop.f32.mrf.mxu0  ;;  %v403_v28 = vpop.f32.mrf.mxu1  ;;  %v422_v35 = vadd.f32 %v1013_v22, %v421_v25  ;;  %v442_v36 = vadd.f32 %v1013_v22, %v441_v26 }
  0xa1   : > { %v384_v31 = vadd.f32 %v1013_v22, %v383_v27  ;;  %v404_v32 = vadd.f32 %v1013_v22, %v403_v28 }
  0xa2   : > { %v509_v45 = vmul.f32 0.2, %v422_v35  ;;  %v517_v46 = vmul.f32 0.2, %v442_v36  ;;  %vm477_vm5 = vcmp.gt.f32.partialorder %v422_v35, 0.0  ;;  %vm485_vm6 = vcmp.gt.f32.partialorder %v442_v36, 0.0 }
  0xa3   : > { %vm462_vm3 = vcmp.gt.f32.partialorder %v384_v31, 0.0  ;;  %v494_v33 = vmul.f32 0.2, %v384_v31  ;;  %vm470_vm4 = vcmp.gt.f32.partialorder %v404_v32, 0.0  ;;  %v502_v34 = vmul.f32 0.2, %v404_v32 }
  0xa4   : > { %v541_v53 = vsel %vm477_vm5, %v422_v35, %v509_v45  ;;  %v549_v54 = vsel %vm485_vm6, %v442_v36, %v517_v46 }
  0xa5   : > { %v526_v39 = vsel %vm462_vm3, %v384_v31, %v494_v33  ;;  %v534_v40 = vsel %vm470_vm4, %v404_v32, %v502_v34 }
  0xa6   : > { %v807_v41 = vpack.c.bf16 %v526_v39, %v525_v37  ;;  %v827_v42 = vpack.c.bf16 %v534_v40, %v533_v38 }
  0xa7   : > { %v423_v43 = vpop.f32.mrf.mxu2  ;;  %v443_v44 = vpop.f32.mrf.mxu3 }
  0xa8   : > { %808 = vst [vmem:[%s1026_s4] sm:$0xff] %v807_v41   ;;  %v424_v47 = vadd.f32 %v1013_v22, %v423_v43  ;;  %v444_v48 = vadd.f32 %v1013_v22, %v443_v44  ;;  %v386_v49 = vpop.f32.mrf.mxu0  ;;  %v406_v50 = vpop.f32.mrf.mxu1 }
  0xa9   : > { %887 = vst [vmem:[%s1026_s4 + $0x20] sm:$0xff] %v827_v42   ;;  %v387_v59 = vadd.f32 %v1013_v22, %v386_v49  ;;  %v407_v60 = vadd.f32 %v1013_v22, %v406_v50 }
  0xaa   : > { %vm478_vm7 = vcmp.gt.f32.partialorder %v424_v47, 0.0  ;;  %v510_v51 = vmul.f32 0.2, %v424_v47  ;;  %vm486_vm8 = vcmp.gt.f32.partialorder %v444_v48, 0.0  ;;  %v518_v52 = vmul.f32 0.2, %v444_v48 }
  0xab   : > { %v495_v1 = vmul.f32 0.2, %v387_v59  ;;  %v503_v2 = vmul.f32 0.2, %v407_v60  ;;  %vm463_vm9 = vcmp.gt.f32.partialorder %v387_v59, 0.0  ;;  %vm471_vm10 = vcmp.gt.f32.partialorder %v407_v60, 0.0 }
  0xac   : > { %v542_v55 = vsel %vm478_vm7, %v424_v47, %v510_v51  ;;  %v550_v56 = vsel %vm486_vm8, %v444_v48, %v518_v52 }
  0xad   : > { %v847_v57 = vpack.c.bf16 %v542_v55, %v541_v53  ;;  %v867_v58 = vpack.c.bf16 %v550_v56, %v549_v54  ;;  %v527_v9 = vsel %vm463_vm9, %v387_v59, %v495_v1  ;;  %v535_v10 = vsel %vm471_vm10, %v407_v60, %v503_v2 }
  0xaf   : > { %891 = vst [vmem:[%s1026_s4 + $0x40] sm:$0xff] %v847_v57   ;;  %v426_v61 = vpop.f32.mrf.mxu2  ;;  %v446_v62 = vpop.f32.mrf.mxu3 }
  0xb0   : > { %895 = vst [vmem:[%s1026_s4 + $0x60] sm:$0xff] %v867_v58   ;;  %v388_v63 = vpop.f32.mrf.mxu0  ;;  %v408_v0 = vpop.f32.mrf.mxu1  ;;  %v427_v7 = vadd.f32 %v1013_v22, %v426_v61  ;;  %v447_v8 = vadd.f32 %v1013_v22, %v446_v62 }
  0xb1   : > { %v389_v3 = vadd.f32 %v1013_v22, %v388_v63  ;;  %v409_v4 = vadd.f32 %v1013_v22, %v408_v0 }
  0xb2   : > { %v511_v17 = vmul.f32 0.2, %v427_v7  ;;  %v519_v18 = vmul.f32 0.2, %v447_v8  ;;  %vm479_vm13 = vcmp.gt.f32.partialorder %v427_v7, 0.0  ;;  %vm487_vm14 = vcmp.gt.f32.partialorder %v447_v8, 0.0 }
  0xb3   : > { %vm464_vm11 = vcmp.gt.f32.partialorder %v389_v3, 0.0  ;;  %v496_v5 = vmul.f32 0.2, %v389_v3  ;;  %vm472_vm12 = vcmp.gt.f32.partialorder %v409_v4, 0.0  ;;  %v504_v6 = vmul.f32 0.2, %v409_v4 }
  0xb4   : > { %v543_v26 = vsel %vm479_vm13, %v427_v7, %v511_v17  ;;  %v551_v27 = vsel %vm487_vm14, %v447_v8, %v519_v18 }
  0xb5   : > { %v528_v11 = vsel %vm464_vm11, %v389_v3, %v496_v5  ;;  %v536_v12 = vsel %vm472_vm12, %v409_v4, %v504_v6 }
  0xb6   : > { %v812_v13 = vpack.c.bf16 %v528_v11, %v527_v9  ;;  %v832_v14 = vpack.c.bf16 %v536_v12, %v535_v10 }
  0xb7   : > { %v428_v15 = vpop.f32.mrf.mxu2  ;;  %v448_v16 = vpop.f32.mrf.mxu3 }
  0xb8   : > { %884 = vst [vmem:[%s1026_s4 + $0x8] sm:$0xff] %v812_v13   ;;  %v429_v19 = vadd.f32 %v1013_v22, %v428_v15  ;;  %v449_v20 = vadd.f32 %v1013_v22, %v448_v16  ;;  %v391_v21 = vpop.f32.mrf.mxu0  ;;  %v411_v23 = vpop.f32.mrf.mxu1 }
  0xb9   : > { %888 = vst [vmem:[%s1026_s4 + $0x28] sm:$0xff] %v832_v14   ;;  %v392_v32 = vadd.f32 %v1013_v22, %v391_v21  ;;  %v412_v33 = vadd.f32 %v1013_v22, %v411_v23 }
  0xba   : > { %vm480_vm15 = vcmp.gt.f32.partialorder %v429_v19, 0.0  ;;  %v512_v24 = vmul.f32 0.2, %v429_v19  ;;  %vm488_vm0 = vcmp.gt.f32.partialorder %v449_v20, 0.0  ;;  %v520_v25 = vmul.f32 0.2, %v449_v20 }
  0xbb   : > { %v497_v38 = vmul.f32 0.2, %v392_v32  ;;  %v505_v39 = vmul.f32 0.2, %v412_v33  ;;  %vm465_vm1 = vcmp.gt.f32.partialorder %v392_v32, 0.0  ;;  %vm473_vm2 = vcmp.gt.f32.partialorder %v412_v33, 0.0 }
  0xbc   : > { %v544_v28 = vsel %vm480_vm15, %v429_v19, %v512_v24  ;;  %v552_v29 = vsel %vm488_vm0, %v449_v20, %v520_v25 }
  0xbd   : > { %v852_v30 = vpack.c.bf16 %v544_v28, %v543_v26  ;;  %v872_v31 = vpack.c.bf16 %v552_v29, %v551_v27  ;;  %v529_v46 = vsel %vm465_vm1, %v392_v32, %v497_v38  ;;  %v537_v47 = vsel %vm473_vm2, %v412_v33, %v505_v39 }
  0xbf   : > { %892 = vst [vmem:[%s1026_s4 + $0x48] sm:$0xff] %v852_v30   ;;  %v431_v34 = vpop.f32.mrf.mxu2  ;;  %v451_v35 = vpop.f32.mrf.mxu3 }
  0xc0   : > { %896 = vst [vmem:[%s1026_s4 + $0x68] sm:$0xff] %v872_v31   ;;  %v393_v36 = vpop.f32.mrf.mxu0  ;;  %v413_v37 = vpop.f32.mrf.mxu1  ;;  %v432_v44 = vadd.f32 %v1013_v22, %v431_v34  ;;  %v452_v45 = vadd.f32 %v1013_v22, %v451_v35 }
  0xc1   : > { %v394_v40 = vadd.f32 %v1013_v22, %v393_v36  ;;  %v414_v41 = vadd.f32 %v1013_v22, %v413_v37 }
  0xc2   : > { %v513_v54 = vmul.f32 0.2, %v432_v44  ;;  %v521_v55 = vmul.f32 0.2, %v452_v45  ;;  %vm481_vm5 = vcmp.gt.f32.partialorder %v432_v44, 0.0  ;;  %vm489_vm6 = vcmp.gt.f32.partialorder %v452_v45, 0.0 }
  0xc3   : > { %vm466_vm3 = vcmp.gt.f32.partialorder %v394_v40, 0.0  ;;  %v498_v42 = vmul.f32 0.2, %v394_v40  ;;  %vm474_vm4 = vcmp.gt.f32.partialorder %v414_v41, 0.0  ;;  %v506_v43 = vmul.f32 0.2, %v414_v41 }
  0xc4   : > { %v545_v62 = vsel %vm481_vm5, %v432_v44, %v513_v54  ;;  %v553_v63 = vsel %vm489_vm6, %v452_v45, %v521_v55 }
  0xc5   : > { %v530_v48 = vsel %vm466_vm3, %v394_v40, %v498_v42  ;;  %v538_v49 = vsel %vm474_vm4, %v414_v41, %v506_v43 }
  0xc6   : > { %v817_v50 = vpack.c.bf16 %v530_v48, %v529_v46  ;;  %v837_v51 = vpack.c.bf16 %v538_v49, %v537_v47 }
  0xc7   : > { %v433_v52 = vpop.f32.mrf.mxu2  ;;  %v453_v53 = vpop.f32.mrf.mxu3 }
  0xc8   : > { %885 = vst [vmem:[%s1026_s4 + $0x10] sm:$0xff] %v817_v50   ;;  %v434_v56 = vadd.f32 %v1013_v22, %v433_v52  ;;  %v454_v57 = vadd.f32 %v1013_v22, %v453_v53  ;;  %v396_v58 = vpop.f32.mrf.mxu0  ;;  %v416_v59 = vpop.f32.mrf.mxu1 }
  0xc9   : > { %889 = vst [vmem:[%s1026_s4 + $0x30] sm:$0xff] %v837_v51   ;;  %v397_v4 = vadd.f32 %v1013_v22, %v396_v58  ;;  %v417_v5 = vadd.f32 %v1013_v22, %v416_v59 }
  0xca   : > { %vm482_vm7 = vcmp.gt.f32.partialorder %v434_v56, 0.0  ;;  %v514_v60 = vmul.f32 0.2, %v434_v56  ;;  %vm490_vm8 = vcmp.gt.f32.partialorder %v454_v57, 0.0  ;;  %v522_v61 = vmul.f32 0.2, %v454_v57 }
  0xcb   : > { %v499_v10 = vmul.f32 0.2, %v397_v4  ;;  %v507_v11 = vmul.f32 0.2, %v417_v5  ;;  %vm467_vm9 = vcmp.gt.f32.partialorder %v397_v4, 0.0  ;;  %vm475_vm10 = vcmp.gt.f32.partialorder %v417_v5, 0.0 }
  0xcc   : > { %v546_v0 = vsel %vm482_vm7, %v434_v56, %v514_v60  ;;  %v554_v1 = vsel %vm490_vm8, %v454_v57, %v522_v61 }
  0xcd   : > { %v857_v2 = vpack.c.bf16 %v546_v0, %v545_v62  ;;  %v877_v3 = vpack.c.bf16 %v554_v1, %v553_v63  ;;  %v531_v18 = vsel %vm467_vm9, %v397_v4, %v499_v10  ;;  %v539_v19 = vsel %vm475_vm10, %v417_v5, %v507_v11 }
  0xcf   : > { %893 = vst [vmem:[%s1026_s4 + $0x50] sm:$0xff] %v857_v2   ;;  %v436_v6 = vpop.f32.mrf.mxu2  ;;  %v456_v7 = vpop.f32.mrf.mxu3 }
  0xd0   : > { %897 = vst [vmem:[%s1026_s4 + $0x70] sm:$0xff] %v877_v3   ;;  %v398_v8 = vpop.f32.mrf.mxu0  ;;  %v418_v9 = vpop.f32.mrf.mxu1  ;;  %v437_v16 = vadd.f32 %v1013_v22, %v436_v6  ;;  %v457_v17 = vadd.f32 %v1013_v22, %v456_v7 }
  0xd1   : > { %v399_v12 = vadd.f32 %v1013_v22, %v398_v8  ;;  %v419_v13 = vadd.f32 %v1013_v22, %v418_v9 }
  0xd2   : > { %v515_v27 = vmul.f32 0.2, %v437_v16  ;;  %v523_v28 = vmul.f32 0.2, %v457_v17  ;;  %vm483_vm13 = vcmp.gt.f32.partialorder %v437_v16, 0.0  ;;  %vm491_vm14 = vcmp.gt.f32.partialorder %v457_v17, 0.0 }
  0xd3   : > { %vm468_vm11 = vcmp.gt.f32.partialorder %v399_v12, 0.0  ;;  %v500_v14 = vmul.f32 0.2, %v399_v12  ;;  %vm476_vm12 = vcmp.gt.f32.partialorder %v419_v13, 0.0  ;;  %v508_v15 = vmul.f32 0.2, %v419_v13 }
  0xd4   : > { %v547_v33 = vsel %vm483_vm13, %v437_v16, %v515_v27  ;;  %v555_v34 = vsel %vm491_vm14, %v457_v17, %v523_v28 }
  0xd5   : > { %v532_v20 = vsel %vm468_vm11, %v399_v12, %v500_v14  ;;  %v540_v21 = vsel %vm476_vm12, %v419_v13, %v508_v15 }
  0xd6   : > { %v822_v23 = vpack.c.bf16 %v532_v20, %v531_v18  ;;  %v842_v24 = vpack.c.bf16 %v540_v21, %v539_v19 }
  0xd7   : > { %v438_v25 = vpop.f32.mrf.mxu2  ;;  %v458_v26 = vpop.f32.mrf.mxu3 }
  0xd8   : > { %886 = vst [vmem:[%s1026_s4 + $0x18] sm:$0xff] %v822_v23   ;;  %v439_v29 = vadd.f32 %v1013_v22, %v438_v25  ;;  %v459_v30 = vadd.f32 %v1013_v22, %v458_v26 }
  0xd9   : > { %890 = vst [vmem:[%s1026_s4 + $0x38] sm:$0xff] %v842_v24  }
  0xda   : > { %vm484_vm15 = vcmp.gt.f32.partialorder %v439_v29, 0.0  ;;  %v516_v31 = vmul.f32 0.2, %v439_v29  ;;  %vm492_vm0 = vcmp.gt.f32.partialorder %v459_v30, 0.0  ;;  %v524_v32 = vmul.f32 0.2, %v459_v30 }
  0xdc   : > { %v548_v35 = vsel %vm484_vm15, %v439_v29, %v516_v31  ;;  %v556_v36 = vsel %vm492_vm0, %v459_v30, %v524_v32 }
  0xdd   : > { %v862_v37 = vpack.c.bf16 %v548_v35, %v547_v33  ;;  %v882_v38 = vpack.c.bf16 %v556_v36, %v555_v34 }
  0xdf   : > { %894 = vst [vmem:[%s1026_s4 + $0x58] sm:$0xff] %v862_v37  }
  0xe0   : > { %898 = vst [vmem:[%s1026_s4 + $0x78] sm:$0xff] %v882_v38  }
  0xe1 PF: > { %s13_s12 = sadd.s32 1, %s926_s12  }
  0xe2   : > { %p10_p4 = scmp.ge.s32.totalorder %s13_s12, 4  }
  0xe4   :  { %12 = sbr.rel (!%p10_p4) target bundleno = 1 (0x1), region = 62 }

</bundles_post_ra>
